<compile_context>
chip_gen: v6e
topology: v6e:2x2x1
jax: 0.10.0
libtpu: 0.0.40
codegen_flags: <defaults>
</compile_context>

<pallas_src>
import jax
import jax.numpy as jnp
from jax.experimental import pallas as pl
from jax.experimental.pallas import tpu as pltpu

# ---- scaled-down config (real model: H=768, 12 heads, 197 ViT tokens) ----------------
B = 2
H = 128                     # bert hidden_size (real: 768)
HEAD_DIM = 64
NUM_HEADS = H // HEAD_DIM   # real: 12
NUM_LAYERS = 12             # number of gate layers / ViT blocks (kept at 12)
S_TEXT = 16                 # length of seq_last_hidden_state
S_IMG = 8                   # ViT token count (real: 197 -> pad to 208 at real scale)
SEQ_CLS = 80                # Classifier is hard-coded to Linear(hidden * 80, num_labels)
NUM_LABELS = 16
LEAKY_SLOPE = 0.01          # F.leaky_relu default
TN_GATE = 512               # Dout tile for the gate kernel (>= dout here -> single tile)
TK_CLS = 2048               # K tile for the classifier weight stream
VMEM_LIMIT = 48 * 1024 * 1024   # within v7x's 64 MiB physical VMEM


# ---------------------------------------------------------------------------------------
# Kernel 1: fused Linear + LeakyReLU + softmax(dim=0), gridded over (layer, Dout tile).
#
# NOTE: the PyTorch code calls F.softmax(...) with NO dim argument on a 3-D tensor ->
# torch's implicit-dim rule picks dim=0 (the batch dim).  We reproduce that exactly.
# Invariant: the batch dim is never tiled/split (each block carries the full B), otherwise
# the per-block softmax over dim 0 would be wrong.  Tiling Dout is safe.
# ---------------------------------------------------------------------------------------
def _gate_kernel(x_ref, w_ref, b_ref, o_ref):
    # x_ref: (1, B, S, Din)  w_ref: (1, Din, tn) bf16  b_ref: (1, 1, tn)  o_ref: (1, B, S, tn) bf16
    _, bsz, seq, din = x_ref.shape
    tn = w_ref.shape[-1]
    # Flatten (B, S) into the matmul M dimension: one MXU matmul instead of B tiny ones.
    x2d = x_ref[0].reshape(bsz * seq, din).astype(jnp.bfloat16)     # tiny cast (B*S rows)
    y = jnp.dot(x2d, w_ref[0], preferred_element_type=jnp.float32)  # bf16 in, f32 accumulate
    y = y.reshape(bsz, seq, tn) + b_ref[0]                          # bias broadcast, f32
    y = jnp.where(y >= 0.0, y, LEAKY_SLOPE * y)                     # F.leaky_relu, f32
    # softmax over dim 0 (batch), per torch's implicit-dim rule
    m = jnp.max(y, axis=0, keepdims=True)
    e = jnp.exp(y - m)
    denom = jnp.sum(e, axis=0, keepdims=True)
    o_ref[0] = (e * pl.reciprocal(denom, approx=True)).astype(o_ref.dtype)


def fused_gate_projection(x, w, b, *, tn=TN_GATE):
    """softmax_dim0(leaky_relu(x @ w + b)) for a stack of layers; bf16 output.

    x: (L, B, S, Din) f32   w: (L, Din, Dout) bf16   b: (L, 1, Dout) f32  ->  (L, B, S, Dout) bf16
    One pallas_call gridded over (layer, Dout tile): layer l+1 / tile j+1 weight DMA hides
    behind the current matmul.
    """
    nlayers, bsz, seq, din = x.shape
    dout = w.shape[-1]
    tn = min(tn, dout)
    assert dout % tn == 0, "Dout must be a multiple of the Dout tile"
    nj = dout // tn
    return pl.pallas_call(
        _gate_kernel,
        out_shape=jax.ShapeDtypeStruct((nlayers, bsz, seq, dout), jnp.bfloat16),
        grid=(nlayers, nj),
        in_specs=[
            pl.BlockSpec((1, bsz, seq, din), lambda l, j: (l, 0, 0, 0)),
            pl.BlockSpec((1, din, tn), lambda l, j: (l, 0, j)),
            pl.BlockSpec((1, 1, tn), lambda l, j: (l, 0, j)),
        ],
        out_specs=pl.BlockSpec((1, bsz, seq, tn), lambda l, j: (l, 0, 0, j)),
        compiler_params=pltpu.CompilerParams(
            dimension_semantics=("parallel", "parallel"),
            vmem_limit_bytes=VMEM_LIMIT,
        ),
    )(x, w, b)


# ---------------------------------------------------------------------------------------
# Kernel 2: Classifier  —  flatten(B, S*H) @ W + b, K-gridded weight stream with an f32
# VMEM accumulator (pl.when init/finalize).  Weight is bf16, unpadded (feat, num_labels).
# ---------------------------------------------------------------------------------------
def _classifier_kernel(x_ref, w_ref, b_ref, o_ref, acc_ref):
    k = pl.program_id(0)

    @pl.when(k == 0)
    def _():
        acc_ref[...] = jnp.zeros_like(acc_ref)

    acc_ref[...] += jnp.dot(x_ref[...].astype(jnp.bfloat16), w_ref[...],
                            preferred_element_type=jnp.float32)

    @pl.when(k == pl.num_programs(0) - 1)
    def _():
        o_ref[...] = (acc_ref[...] + b_ref[...]).astype(o_ref.dtype)


def classifier_forward(last_hidden_state, w, b, *, tk=TK_CLS):
    """x.view(x.size(0), -1) @ W + b.  W is bf16 (feat, num_labels), no lane padding."""
    bsz = last_hidden_state.shape[0]
    xf = last_hidden_state.reshape(bsz, -1)                 # x.view(x.size(0), -1)
    feat = xf.shape[1]
    nlab = w.shape[1]
    tk = min(tk, feat)
    assert feat % tk == 0, "flattened feature dim must be a multiple of the K tile"
    nk = feat // tk
    b2 = b.reshape(1, nlab)
    return pl.pallas_call(
        _classifier_kernel,
        out_shape=jax.ShapeDtypeStruct((bsz, nlab), jnp.float32),
        grid=(nk,),
        in_specs=[
            pl.BlockSpec((bsz, tk), lambda k: (0, k)),
            pl.BlockSpec((tk, nlab), lambda k: (k, 0)),
            pl.BlockSpec((1, nlab), lambda k: (0, 0)),
        ],
        out_specs=pl.BlockSpec((bsz, nlab), lambda k: (0, 0)),   # resident accumulator tile
        scratch_shapes=[pltpu.VMEM((bsz, nlab), jnp.float32)],
        compiler_params=pltpu.CompilerParams(
            dimension_semantics=("arbitrary",),
            vmem_limit_bytes=VMEM_LIMIT,
        ),
    )(xf, w, b2)


# ---------------------------------------------------------------------------------------
# Model glue (plain JAX): get_visual_prompt + forward
# ---------------------------------------------------------------------------------------
def get_visual_prompt(params, img_features, seq_last_hidden_state):
    bsz = seq_last_hidden_state.shape[0]
    # text_key_val = softmax(leaky_relu(encoder_text(seq_last_hidden_state)))  -- one call
    text_key_val = fused_gate_projection(
        seq_last_hidden_state[None],                        # (1, B, S_TEXT, H)
        params["encoder_text_w"], params["encoder_text_b"])[0]
    # all 12 gates fused into one layer-gridded call: (12, B, S_IMG, 2H), bf16
    imgs_key_val = fused_gate_projection(
        img_features, params["gates_w"], params["gates_b"])
    # single concat for all layers instead of 12 (bf16 traffic)
    text_b = jnp.broadcast_to(text_key_val[None], (NUM_LAYERS,) + text_key_val.shape)
    key_val = jnp.concatenate([text_b, imgs_key_val], axis=2)   # (12, B, S_TEXT+S_IMG, 2H)

    result = []
    for idx in range(NUM_LAYERS):
        kv = key_val[idx]                                        # (B, S_TEXT+S_IMG, 2H)
        key = kv[..., :H].reshape(bsz, NUM_HEADS, -1, HEAD_DIM)  # split(H, dim=-1)[0]
        value = kv[..., H:].reshape(bsz, NUM_HEADS, -1, HEAD_DIM)
        result.append((key, value))
    return result


def ee_model_forward(params, attention_mask, seq_last_hidden_state, img_features,
                     last_hidden_state, labels=None):
    # TODO(synk): first BERT call producing seq_last_hidden_state is a pretrained backbone;
    #             its output is supplied as an input.
    bsz = attention_mask.shape[0]

    # use_prompt branch
    prompt_guids = get_visual_prompt(params, img_features, seq_last_hidden_state)
    prompt_guids_length = prompt_guids[0][0].shape[2]
    prompt_guids_mask = jnp.ones((bsz, prompt_guids_length), dtype=attention_mask.dtype)
    prompt_attention_mask = jnp.concatenate([prompt_guids_mask, attention_mask], axis=1)
    assert prompt_attention_mask.shape == (bsz, prompt_guids_length + attention_mask.shape[1])

    # TODO(synk): second BERT call (consumes prompt_guids as past_key_values and
    #             prompt_attention_mask) is a pretrained backbone; its last_hidden_state
    #             is supplied as an input here.
    logits = classifier_forward(last_hidden_state, params["cls_w"], params["cls_b"])

    if labels is not None:
        logp = logits - jax.scipy.special.logsumexp(logits, axis=-1, keepdims=True)
        loss = -jnp.mean(jnp.take_along_axis(logp, labels.reshape(-1, 1), axis=-1))
        return loss, logits
    return logits


# ---------------------------------------------------------------------------------------
# Deterministic parameter init (shapes follow the module __init__); weights stored bf16.
# ---------------------------------------------------------------------------------------
def init_params(key):
    def lin(k, din, dout):
        kw, kb = jax.random.split(k)
        w = jax.random.normal(kw, (din, dout), jnp.float32) * 0.02
        b = jax.random.normal(kb, (dout,), jnp.float32) * 0.02
        return w, b

    k_enc, k_gate, k_cls = jax.random.split(key, 3)

    enc_w, enc_b = lin(k_enc, H, 2 * H)                       # encoder_text: 768 -> 2*768
    gate_keys = jax.random.split(k_gate, NUM_LAYERS)
    gws, gbs = [], []
    for i in range(NUM_LAYERS):
        w, b = lin(gate_keys[i], 4 * H, 2 * H)                # gates[i]: 4*768 -> 2*768
        gws.append(w)
        gbs.append(b)
    gates_w = jnp.stack(gws, axis=0)                          # (12, 4H, 2H)
    gates_b = jnp.stack(gbs, axis=0).reshape(NUM_LAYERS, 1, 2 * H)

    cls_w, cls_b = lin(k_cls, H * SEQ_CLS, NUM_LABELS)        # Classifier: hidden*80 -> labels

    return {
        # bf16 weights in HBM (matmul streams); f32 biases (tiny, added in f32)
        "encoder_text_w": enc_w.astype(jnp.bfloat16).reshape(1, H, 2 * H),
        "encoder_text_b": enc_b.reshape(1, 1, 2 * H),
        "gates_w": gates_w.astype(jnp.bfloat16),
        "gates_b": gates_b,
        "cls_w": cls_w.astype(jnp.bfloat16),                  # (feat, num_labels), NO lane pad
        "cls_b": cls_b,
    }


if __name__ == "__main__":
    key = jax.random.PRNGKey(0)
    kp, k1, k2, k3, k4 = jax.random.split(key, 5)
    params = init_params(kp)

    # Synthetic backbone outputs / inputs (deterministic).
    seq_last_hidden_state = jax.random.normal(k1, (B, S_TEXT, H), jnp.float32)
    img_features = jax.random.normal(k2, (NUM_LAYERS, B, S_IMG, 4 * H), jnp.float32)
    last_hidden_state = jax.random.normal(k3, (B, SEQ_CLS, H), jnp.float32)
    attention_mask = jnp.ones((B, SEQ_CLS), jnp.float32)
    labels = jax.random.randint(k4, (B,), 0, NUM_LABELS)

    loss, logits = ee_model_forward(params, attention_mask, seq_last_hidden_state,
                                    img_features, last_hidden_state, labels=labels)
    jax.block_until_ready((loss, logits))
    assert logits.shape == (B, NUM_LABELS)
    assert jnp.isfinite(loss)
    print("KERNEL_OK")
</pallas_src>

<mosaic_0001>
module attributes {stable_mosaic.version = 11 : i64} {
  func.func @_gate_kernel(%arg0: i32, %arg1: i32, %arg2: memref<1x2x16x128xf32, #tpu.memory_space<vmem>>, %arg3: memref<1x128x256xbf16, #tpu.memory_space<vmem>>, %arg4: memref<1x1x256xf32, #tpu.memory_space<vmem>>, %arg5: memref<1x2x16x256xbf16, #tpu.memory_space<vmem>>) attributes {dimension_semantics = [#tpu.dimension_semantics<parallel>, #tpu.dimension_semantics<parallel>], iteration_bounds = array<i64: 1, 1>, scalar_prefetch = 0 : i64, scratch_operands = 0 : i64, tpu.core_type = #tpu.core_type<tc>, window_params = [{transform_indices = @transform_0, window_bounds = array<i64: 1, 2, 16, 128>}, {transform_indices = @transform_1, window_bounds = array<i64: 1, 128, 256>}, {transform_indices = @transform_2, window_bounds = array<i64: 1, 1, 256>}, {transform_indices = @transform_3, window_bounds = array<i64: 1, 2, 16, 256>}]} {
    %c0 = arith.constant 0 : index
    %c0_0 = arith.constant 0 : index
    %c0_1 = arith.constant 0 : index
    %c0_2 = arith.constant 0 : index
    %0 = vector.load %arg2[%c0, %c0_0, %c0_1, %c0_2] : memref<1x2x16x128xf32, #tpu.memory_space<vmem>>, vector<1x2x16x128xf32>
    %1 = vector.shape_cast %0 : vector<1x2x16x128xf32> to vector<2x16x128xf32>
    %2 = vector.shape_cast %1 : vector<2x16x128xf32> to vector<32x128xf32>
    %3 = arith.truncf %2 : vector<32x128xf32> to vector<32x128xbf16>
    %c0_3 = arith.constant 0 : index
    %c0_4 = arith.constant 0 : index
    %c0_5 = arith.constant 0 : index
    %4 = vector.load %arg3[%c0_3, %c0_4, %c0_5] : memref<1x128x256xbf16, #tpu.memory_space<vmem>>, vector<1x128x256xbf16>
    %5 = vector.shape_cast %4 : vector<1x128x256xbf16> to vector<128x256xbf16>
    %cst = arith.constant dense<0.000000e+00> : vector<32x256xf32>
    %6 = tpu.matmul %3, %5, %cst {dimension_numbers = #tpu.dot_dimension_numbers<[1], [0], [0], [1], [0, 0, 1, 1], [], []>} : vector<32x128xbf16>, vector<128x256xbf16>, vector<32x256xf32> -> vector<32x256xf32>
    %7 = vector.shape_cast %6 : vector<32x256xf32> to vector<2x16x256xf32>
    %c0_6 = arith.constant 0 : index
    %c0_7 = arith.constant 0 : index
    %c0_8 = arith.constant 0 : index
    %8 = vector.load %arg4[%c0_6, %c0_7, %c0_8] : memref<1x1x256xf32, #tpu.memory_space<vmem>>, vector<1x1x256xf32>
    %9 = vector.shape_cast %8 : vector<1x1x256xf32> to vector<1x256xf32>
    %10 = vector.shape_cast %9 : vector<1x256xf32> to vector<1x1x256xf32>
    %11 = vector.broadcast %10 : vector<1x1x256xf32> to vector<2x16x256xf32>
    %12 = arith.addf %7, %11 : vector<2x16x256xf32>
    %cst_9 = arith.constant 0.000000e+00 : f32
    %13 = vector.broadcast %cst_9 : f32 to vector<2x16x256xf32>
    %14 = arith.cmpf oge, %12, %13 : vector<2x16x256xf32>
    %cst_10 = arith.constant 0.00999999977 : f32
    %15 = vector.broadcast %cst_10 : f32 to vector<2x16x256xf32>
    %16 = arith.mulf %15, %12 : vector<2x16x256xf32>
    %17 = arith.select %14, %12, %16 : vector<2x16x256xi1>, vector<2x16x256xf32>
    %cst_11 = arith.constant dense<0xFF800000> : vector<16x256xf32>
    %18 = vector.multi_reduction <maximumf>, %17, %cst_11 [0] : vector<2x16x256xf32> to vector<16x256xf32>
    %19 = vector.shape_cast %18 : vector<16x256xf32> to vector<1x16x256xf32>
    %20 = vector.broadcast %19 : vector<1x16x256xf32> to vector<2x16x256xf32>
    %21 = arith.subf %17, %20 : vector<2x16x256xf32>
    %22 = math.exp %21 : vector<2x16x256xf32>
    %cst_12 = arith.constant dense<0.000000e+00> : vector<16x256xf32>
    %23 = vector.multi_reduction <add>, %22, %cst_12 [0] : vector<2x16x256xf32> to vector<16x256xf32>
    %24 = vector.shape_cast %23 : vector<16x256xf32> to vector<1x16x256xf32>
    %25 = tpu.reciprocal %24 {approx = true} : vector<1x16x256xf32> -> vector<1x16x256xf32>
    %26 = vector.broadcast %25 : vector<1x16x256xf32> to vector<2x16x256xf32>
    %27 = arith.mulf %22, %26 : vector<2x16x256xf32>
    %28 = arith.truncf %27 : vector<2x16x256xf32> to vector<2x16x256xbf16>
    %c0_13 = arith.constant 0 : index
    %c0_14 = arith.constant 0 : index
    %c0_15 = arith.constant 0 : index
    %c0_16 = arith.constant 0 : index
    %29 = vector.load %arg5[%c0_13, %c0_14, %c0_15, %c0_16] : memref<1x2x16x256xbf16, #tpu.memory_space<vmem>>, vector<1x2x16x256xbf16>
    %30 = vector.shape_cast %29 : vector<1x2x16x256xbf16> to vector<2x16x256xbf16>
    %31 = vector.shape_cast %28 : vector<2x16x256xbf16> to vector<1x2x16x256xbf16>
    tpu.vector_store %arg5[%c0_13, %c0_14, %c0_15, %c0_16], %31 {strides = array<i32>} : memref<1x2x16x256xbf16, #tpu.memory_space<vmem>>, vector<1x2x16x256xbf16>,
    return
  }
  func.func @transform_0(%arg0: i32, %arg1: i32) -> (i32, i32, i32, i32) {
    %c0_i32 = arith.constant 0 : i32
    %c0_i32_0 = arith.constant 0 : i32
    %c0_i32_1 = arith.constant 0 : i32
    %c0_i32_2 = arith.constant 0 : i32
    return %arg0, %c0_i32, %c0_i32_0, %c0_i32_1 : i32, i32, i32, i32
  }
  func.func @transform_1(%arg0: i32, %arg1: i32) -> (i32, i32, i32) {
    %c0_i32 = arith.constant 0 : i32
    %c0_i32_0 = arith.constant 0 : i32
    return %arg0, %c0_i32, %arg1 : i32, i32, i32
  }
  func.func @transform_2(%arg0: i32, %arg1: i32) -> (i32, i32, i32) {
    %c0_i32 = arith.constant 0 : i32
    %c0_i32_0 = arith.constant 0 : i32
    return %arg0, %c0_i32, %arg1 : i32, i32, i32
  }
  func.func @transform_3(%arg0: i32, %arg1: i32) -> (i32, i32, i32, i32) {
    %c0_i32 = arith.constant 0 : i32
    %c0_i32_0 = arith.constant 0 : i32
    %c0_i32_1 = arith.constant 0 : i32
    return %arg0, %c0_i32, %c0_i32_0, %arg1 : i32, i32, i32, i32
  }
}

</mosaic_0001>

<bundles_post_ra>
// kernel: tpu_custom_call.1
= control target key start
LH: loop header
LB: loop body
LE: loop exit
PB: predicated region body
PF: predicated region fallthrough
CT: control target
= control target key end

     0   :  { %8 = vsyncpa [#allocation3], 0  ;;  %s540_s0 = inlined_call_operand.hbm [shape: f32[1,2,16,128], index: 0, kind: input, shape index: {}]   ;;  %s541_s1 = inlined_call_operand.hbm [shape: bf16[1,128,256], index: 1, kind: input, shape index: {}]   ;;  %s542_s2 = inlined_call_operand.vmem [shape: f32[1,1,256], index: 2, kind: input, shape index: {}]   ;;  %s543_s3 = inlined_call_operand.hbm [shape: bf16[1,2,16,256], index: 3, kind: output, shape index: {}]  }
   0x1   :  { %9 = vsyncpa [#allocation6], 0 }
   0x2   :  { %10 = vsyncpa [#allocation4], 0  ;;  %s493_s12 = smov [#allocation2]  }
   0x3   :  { %s16_s13 = sshll.u32 %s493_s12, 4  ;;  %s17_s13 = int_to_ptr.vmem [resolvable:$true] %s16_s13 }
   0x4   :  { %s435_s14 = scalar_lea.vmem %s17_s13, 512  ;;  %p440_p1 = scmp.lt.s32.totalorder %s17_s13, %s17_s13 }
   0x5   :  { %p436_p0 = scmp.ne.s32.totalorder %s17_s13, %s435_s14  ;;  %p441_p2 = scmp.lt.s32.totalorder %s435_s14, %s435_s14 }
   0x7   :  { %p442_p3 = por %p441_p2, %p440_p1 }
   0x9   :  { %p443_p4 = pnand %p442_p3, %p436_p0 }
   0xb   :  { %446 = shalt.err (!%p443_p4)
}
   0xc   :  { %s494_s15 = smov 128   ;;  %s495_s16 = smov 8  }
   0xd   :  { %22 = dma.hbm_to_vmem [thread:$0]  %s540_s0, 512, %s17_s13, [#allocation3], %s494_s15, %s494_s15, %s495_s16  }
   0xe   :  { %s496_s19 = smov [#allocation5]  }
   0xf   :  { %s28_s20 = sshll.u32 %s496_s19, 4  ;;  %s29_s20 = int_to_ptr.vmem [resolvable:$true] %s28_s20 }
  0x10   :  { %s455_s21 = scalar_lea.vmem %s29_s20, 2048  ;;  %p460_p6 = scmp.lt.s32.totalorder %s29_s20, %s29_s20 }
  0x11   :  { %p456_p5 = scmp.ne.s32.totalorder %s29_s20, %s455_s21  ;;  %p461_p7 = scmp.lt.s32.totalorder %s455_s21, %s455_s21 }
  0x13   :  { %p462_p8 = por %p461_p7, %p460_p6 }
  0x15   :  { %p463_p9 = pnand %p462_p8, %p456_p5 }
  0x17   :  { %466 = shalt.err (!%p463_p9)
}
  0x18   :  { %34 = dma.hbm_to_vmem [thread:$0]  %s541_s1, 2048, %s29_s20, [#allocation6], %s494_s15, %s494_s15, %s495_s16  }
  0x19   :  { %487 = dma.done.wait [#allocation3], 512  }
  0x1a   :  { %488 = vsyncadd [#allocation3], 4294966784 }
  0x1b   :  { %489 = dma.done.wait [#allocation6], 2048  }
  0x1c   :  { %490 = vsyncadd [#allocation6], 4294965248  ;;  %v497_v0 = vmov 0   ;;  %v379_v1 = vld [vmem:[#allocation5 + $0x74] ss:$8 sps:$4 sm:$0xff]   ;;  %v44_v17 = vld [vmem:[#allocation2] sm:$0xff]  ;;  %v201_v23 = vlaneseq }
  0x1d   :  { %178 = vmatprep.mubr.bf16.mxu0 %v497_v0  ;;  %188 = vmatprep.mubr.bf16.mxu1 %v497_v0  ;;  %v381_v2 = vld [vmem:[#allocation5 + $0x70] ss:$8 sps:$4 sm:$0xff]   ;;  %v382_v3 = vld [vmem:[#allocation5 + $0x64] ss:$8 sps:$4 sm:$0xff]   ;;  %v384_v4 = vld [vmem:[#allocation5 + $0x60] ss:$8 sps:$4 sm:$0xff]  }
  0x1e   :  { %146 = vmatprep.subr.bf16.mxu0 %v379_v1  ;;  %357 = vmatprep.subr.bf16.mxu1 %v379_v1  ;;  %v385_v5 = vld [vmem:[#allocation5 + $0x54] ss:$8 sps:$4 sm:$0xff]   ;;  %v387_v6 = vld [vmem:[#allocation5 + $0x50] ss:$8 sps:$4 sm:$0xff]   ;;  %v388_v7 = vld [vmem:[#allocation5 + $0x44] ss:$8 sps:$4 sm:$0xff]  }
  0x1f   :  { %147 = vmatpush1.bf16.msra.mxu0 %v381_v2  ;;  %365 = vmatpush1.bf16.msra.mxu1 %v381_v2  ;;  %v390_v8 = vld [vmem:[#allocation5 + $0x40] ss:$8 sps:$4 sm:$0xff]   ;;  %v391_v9 = vld [vmem:[#allocation5 + $0x34] ss:$8 sps:$4 sm:$0xff]   ;;  %v393_v10 = vld [vmem:[#allocation5 + $0x30] ss:$8 sps:$4 sm:$0xff]  }
  0x20   :  { %148 = vmatprep.subr.bf16.mxu0 %v382_v3  ;;  %358 = vmatprep.subr.bf16.mxu1 %v382_v3  ;;  %v394_v11 = vld [vmem:[#allocation5 + $0x24] ss:$8 sps:$4 sm:$0xff]   ;;  %v396_v12 = vld [vmem:[#allocation5 + $0x20] ss:$8 sps:$4 sm:$0xff]   ;;  %v397_v13 = vld [vmem:[#allocation5 + $0x14] ss:$8 sps:$4 sm:$0xff]  }
  0x21   :  { %v399_v14 = vld [vmem:[#allocation5 + $0x10] ss:$8 sps:$4 sm:$0xff]   ;;  %v400_v15 = vld [vmem:[#allocation5 + $0x4] ss:$8 sps:$4 sm:$0xff]   ;;  %v402_v16 = vld [vmem:[#allocation5] ss:$8 sps:$4 sm:$0xff]  }
  0x22   :  { %v45_v18 = vld [vmem:[#allocation2 + $0x8] sm:$0xff]  ;;  %v46_v19 = vld [vmem:[#allocation2 + $0x10] sm:$0xff]  ;;  %v47_v20 = vld [vmem:[#allocation2 + $0x18] sm:$0xff]  ;;  %v202_v24 = vshrl.u32 %v201_v23, 7 }
  0x23   :  { %149 = vmatpush1.bf16.msra.mxu0 %v384_v4  ;;  %366 = vmatpush1.bf16.msra.mxu1 %v384_v4  ;;  %v48_v21 = vpack.c.bf16 %v45_v18, %v44_v17  ;;  %v49_v22 = vpack.c.bf16 %v47_v20, %v46_v19  ;;  %v199_v26 = vld [vmem:[%s542_s2] sm:$0x3]  ;;  %s498_s2 = smov [#allocation7]  }
  0x24   :  { %150 = vmatprep.subr.bf16.mxu0 %v385_v5  ;;  %359 = vmatprep.subr.bf16.mxu1 %v385_v5  ;;  %v203_v25 = vsub.s32 0, %v202_v24  ;;  %v207_v27 = vsub.s32 1, %v202_v24  ;;  %s320_s24 = sshll.u32 %s498_s2, 4  ;;  %s321_s24 = int_to_ptr.vmem [resolvable:$true] %s320_s24 }
  0x25   :  { %s467_s25 = scalar_lea.vmem %s321_s24, 512  ;;  %p472_p11 = scmp.lt.s32.totalorder %s321_s24, %s321_s24 }
  0x26   :  { %v204_v28 = vrot.slane %v199_v26, %v203_v25  ;;  %v208_v31 = vrot.slane %v199_v26, %v207_v27  ;;  %p468_p10 = scmp.ne.s32.totalorder %s321_s24, %s467_s25  ;;  %p473_p12 = scmp.lt.s32.totalorder %s467_s25, %s467_s25 }
  0x27   :  { %151 = vmatpush1.bf16.msra.mxu0 %v387_v6  ;;  %367 = vmatpush1.bf16.msra.mxu1 %v387_v6 }
  0x28   :  { %152 = vmatprep.subr.bf16.mxu0 %v388_v7  ;;  %360 = vmatprep.subr.bf16.mxu1 %v388_v7  ;;  %p474_p13 = por %p473_p12, %p472_p11 }
  0x2a   :  { %p475_p0 = pnand %p474_p13, %p468_p10 }
  0x2b   :  { %153 = vmatpush1.bf16.msra.mxu0 %v390_v8  ;;  %368 = vmatpush1.bf16.msra.mxu1 %v390_v8 }
  0x2c   :  { %154 = vmatprep.subr.bf16.mxu0 %v391_v9  ;;  %361 = vmatprep.subr.bf16.mxu1 %v391_v9 }
  0x2f   :  { %155 = vmatpush1.bf16.msra.mxu0 %v393_v10  ;;  %369 = vmatpush1.bf16.msra.mxu1 %v393_v10 }
  0x30   :  { %156 = vmatprep.subr.bf16.mxu0 %v394_v11  ;;  %362 = vmatprep.subr.bf16.mxu1 %v394_v11 }
  0x33   :  { %157 = vmatpush1.bf16.msra.mxu0 %v396_v12  ;;  %370 = vmatpush1.bf16.msra.mxu1 %v396_v12 }
  0x34   :  { %158 = vmatprep.subr.bf16.mxu0 %v397_v13  ;;  %363 = vmatprep.subr.bf16.mxu1 %v397_v13 }
  0x37   :  { %159 = vmatpush1.bf16.msra.mxu0 %v399_v14  ;;  %371 = vmatpush1.bf16.msra.mxu1 %v399_v14 }
  0x38   :  { %160 = vmatprep.subr.bf16.mxu0 %v400_v15  ;;  %364 = vmatprep.subr.bf16.mxu1 %v400_v15 }
  0x3b   :  { %161 = vmatpush1.bf16.msra.mxu0 %v402_v16  ;;  %372 = vmatpush1.bf16.msra.mxu1 %v402_v16 }
  0x3e   :  { %179 = vmatmul.mubr.bf16.vlgmr.msra.gmra.mxu0 %v48_v21  ;;  %189 = vmatmul.mubr.bf16.vlgmr.msra.gmra.mxu1 %v49_v22 }
  0xfe   :  { %v180_v29 = vpop.f32.mrf.mxu0  ;;  %v190_v30 = vpop.f32.mrf.mxu1 }
  0xff   :  { %v211_v32 = vadd.f32 %v204_v28, %v180_v29  ;;  %v215_v33 = vadd.f32 %v204_v28, %v190_v30 }
 0x100   :  { %v182_v34 = vpop.f32.mrf.mxu0  ;;  %v192_v35 = vpop.f32.mrf.mxu1 }
 0x101   :  { %vm219_vm0 = vcmp.ge.f32.partialorder %v211_v32, 0.0  ;;  %v227_v36 = vmul.f32 0.01, %v211_v32  ;;  %vm223_vm1 = vcmp.ge.f32.partialorder %v215_v33, 0.0  ;;  %v231_v37 = vmul.f32 0.01, %v215_v33 }
 0x102   :  { %v212_v38 = vadd.f32 %v208_v31, %v182_v34  ;;  %v216_v39 = vadd.f32 %v208_v31, %v192_v35  ;;  %v184_v40 = vpop.f32.mrf.mxu0  ;;  %v194_v41 = vpop.f32.mrf.mxu1 }
 0x103   :  { %v235_v42 = vsel %vm219_vm0, %v211_v32, %v227_v36  ;;  %v239_v43 = vsel %vm223_vm1, %v215_v33, %v231_v37  ;;  %v213_v44 = vadd.f32 %v204_v28, %v184_v40  ;;  %v217_v45 = vadd.f32 %v204_v28, %v194_v41 }
 0x104   :  { %v243_v46 = vmax.f32 %v235_v42, %v239_v43  ;;  %vm220_vm2 = vcmp.ge.f32.partialorder %v212_v38, 0.0  ;;  %v228_v47 = vmul.f32 0.01, %v212_v38  ;;  %vm224_vm3 = vcmp.ge.f32.partialorder %v216_v39, 0.0  ;;  %v186_v48 = vpop.f32.mrf.mxu0  ;;  %v196_v49 = vpop.f32.mrf.mxu1 }
 0x105   :  { %v232_v50 = vmul.f32 0.01, %v216_v39  ;;  %vm221_vm4 = vcmp.ge.f32.partialorder %v213_v44, 0.0  ;;  %v229_v51 = vmul.f32 0.01, %v213_v44  ;;  %vm225_vm5 = vcmp.ge.f32.partialorder %v217_v45, 0.0 }
 0x106   :  { %v247_v52 = vsub.f32 %v235_v42, %v243_v46  ;;  %v251_v53 = vsub.f32 %v239_v43, %v243_v46  ;;  %v236_v54 = vsel %vm220_vm2, %v212_v38, %v228_v47  ;;  %v233_v55 = vmul.f32 0.01, %v217_v45 }
 0x107   :  { %v240_v56 = vsel %vm224_vm3, %v216_v39, %v232_v50  ;;  %v237_v57 = vsel %vm221_vm4, %v213_v44, %v229_v51  ;;  %v214_v58 = vadd.f32 %v208_v31, %v186_v48  ;;  %v218_v59 = vadd.f32 %v208_v31, %v196_v49 }
 0x108   :  { %v255_v60 = vmul.f32 1.442695, %v247_v52  ;;  %v263_v61 = vmul.f32 1.442695, %v251_v53  ;;  %v244_v62 = vmax.f32 %v236_v54, %v240_v56  ;;  %v241_v63 = vsel %vm225_vm5, %v217_v45, %v233_v55 }
 0x109   :  { %v245_v0 = vmax.f32 %v237_v57, %v241_v63  ;;  %vm222_vm6 = vcmp.ge.f32.partialorder %v214_v58, 0.0  ;;  %v230_v1 = vmul.f32 0.01, %v214_v58  ;;  %vm226_vm7 = vcmp.ge.f32.partialorder %v218_v59, 0.0 }
 0x10a   :  { %403 = vpow2.f32 %v255_v60  ;;  %v248_v2 = vsub.f32 %v236_v54, %v244_v62  ;;  %v252_v3 = vsub.f32 %v240_v56, %v244_v62  ;;  %v234_v4 = vmul.f32 0.01, %v218_v59 }
 0x10b   :  { %405 = vpow2.f32 %v263_v61  ;;  %v249_v5 = vsub.f32 %v237_v57, %v245_v0  ;;  %v253_v6 = vsub.f32 %v241_v63, %v245_v0  ;;  %v238_v7 = vsel %vm222_vm6, %v214_v58, %v230_v1 }
 0x10c   :  { %v257_v8 = vmul.f32 1.442695, %v248_v2  ;;  %v265_v9 = vmul.f32 1.442695, %v252_v3  ;;  %v242_v10 = vsel %vm226_vm7, %v218_v59, %v234_v4 }
 0x10d   :  { %v259_v11 = vmul.f32 1.442695, %v249_v5  ;;  %v267_v12 = vmul.f32 1.442695, %v253_v6  ;;  %v246_v13 = vmax.f32 %v238_v7, %v242_v10 }
 0x10e   :  { %407 = vpow2.f32 %v257_v8 }
 0x10f   :  { %409 = vpow2.f32 %v265_v9  ;;  %v250_v14 = vsub.f32 %v238_v7, %v246_v13  ;;  %v254_v15 = vsub.f32 %v242_v10, %v246_v13 }
 0x110   :  { %411 = vpow2.f32 %v259_v11 }
 0x111   :  { %413 = vpow2.f32 %v267_v12  ;;  %v261_v16 = vmul.f32 1.442695, %v250_v14  ;;  %v269_v17 = vmul.f32 1.442695, %v254_v15 }
 0x113   :  { %415 = vpow2.f32 %v261_v16 }
 0x114   :  { %417 = vpow2.f32 %v269_v17 }
 0x117   :  { %v404_v18 = vpop.eup %403 }
 0x118   :  { %v406_v19 = vpop.eup %405 }
 0x119   :  { %v271_v20 = vadd.f32 %v406_v19, %v404_v18 }
 0x11b   :  { %v408_v21 = vpop.eup %407  ;;  %419 = vrcp.f32 %v271_v20 }
 0x11c   :  { %v410_v22 = vpop.eup %409 }
 0x11d   :  { %v412_v23 = vpop.eup %411  ;;  %v272_v24 = vadd.f32 %v410_v22, %v408_v21 }
 0x11e   :  { %v414_v25 = vpop.eup %413 }
 0x11f   :  { %421 = vrcp.f32 %v272_v24  ;;  %v273_v26 = vadd.f32 %v414_v25, %v412_v23 }
 0x120   :  { %v416_v27 = vpop.eup %415 }
 0x121   :  { %v418_v28 = vpop.eup %417  ;;  %423 = vrcp.f32 %v273_v26 }
 0x122   :  { %v274_v29 = vadd.f32 %v418_v28, %v416_v27 }
 0x124   :  { %425 = vrcp.f32 %v274_v29 }
 0x128   :  { %v420_v30 = vpop.eup %419 }
 0x129   :  { %v279_v32 = vmul.f32 %v420_v30, %v404_v18  ;;  %v283_v34 = vmul.f32 %v420_v30, %v406_v19 }
 0x12c   :  { %v422_v31 = vpop.eup %421 }
 0x12d   :  { %v280_v33 = vmul.f32 %v422_v31, %v408_v21  ;;  %v284_v35 = vmul.f32 %v422_v31, %v410_v22 }
 0x12e   :  { %v424_v36 = vpop.eup %423 }
 0x12f   :  { %v353_v37 = vpack.c.bf16 %v280_v33, %v279_v32  ;;  %v355_v38 = vpack.c.bf16 %v284_v35, %v283_v34  ;;  %v281_v40 = vmul.f32 %v424_v36, %v412_v23  ;;  %v285_v42 = vmul.f32 %v424_v36, %v414_v25 }
 0x131   :  { %v426_v39 = vpop.eup %425  ;;  %311 = vst [vmem:[#allocation7] sm:$0xff] %v353_v37  ;;  %313 = vst [vmem:[#allocation7 + $0x10] sm:$0xff] %v355_v38 }
 0x132   :  { %v282_v41 = vmul.f32 %v426_v39, %v416_v27  ;;  %v286_v43 = vmul.f32 %v426_v39, %v418_v28 }
 0x134   :  { %v354_v44 = vpack.c.bf16 %v282_v41, %v281_v40  ;;  %v356_v45 = vpack.c.bf16 %v286_v43, %v285_v42 }
 0x136   :  { %312 = vst [vmem:[#allocation7 + $0x8] sm:$0xff] %v354_v44  ;;  %314 = vst [vmem:[#allocation7 + $0x18] sm:$0xff] %v356_v45 }
 0x137   :  { %478 = shalt.err (!%p475_p0)
}
 0x138   :  { %326 = dma.vmem_to_hbm [thread:$0]  %s321_s24, 512, %s543_s3, [#allocation4], %s494_s15, %s494_s15, %s495_s16  }
 0x139   :  { %491 = dma.done.wait [#allocation4], 512  }
 0x13a   :  { %492 = vsyncadd [#allocation4], 4294966784 }
 0x13b   :  { %330 = vsyncpa [#allocation3], 1 }
 0x13c   :  { %331 = vsyncpa [#allocation6], 1 }
 0x13d   :  { %332 = vsyncpa [#allocation4], 1 }

</bundles_post_ra>
